<compile_context>
chip_gen: v7x
topology: tpu7x:2x2x1
jax: 0.10.0
libtpu: 0.0.40
codegen_flags: <defaults>
</compile_context>

<pallas_src>
import jax
import jax.numpy as jnp
from jax.experimental import pallas as pl
from jax.experimental.pallas import tpu as pltpu  # noqa: F401  (TPU backend assumed)

PAD = 128          # lane-dense padded feature width for all layers
NUM_LAYERS = 6     # residual, conv1..conv4, op


def gcn4_fc_kernel(a_ref, x_ref, w_ref, b_ref, o_ref):
    # a_ref : [N, N]        bf16  normalized adjacency  D^-1/2 (A+I) D^-1/2
    # x_ref : [N, PAD]      bf16  node features, zero-padded to 128 lanes
    # w_ref : [6, PAD, PAD] bf16  packed weights (res, conv1..4, op), zero-padded
    # b_ref : [8, PAD]      f32   packed biases  (rows 0..5 used),   zero-padded
    # o_ref : [N, PAD]      f32   logits (real values in cols [:num_classes])
    a = a_ref[...]
    x = x_ref[...]

    def affine(h_bf16, layer):
        # h @ W_l + b_l   (bf16 operands, f32 MXU accumulation)
        return (jnp.dot(h_bf16, w_ref[layer], preferred_element_type=jnp.float32)
                + b_ref[layer:layer + 1, :])

    def graph_conv(h_bf16, layer):
        # A_hat @ (H @ W_l) + b_l   (DGL GraphConv, norm='both', bias=True)
        hw = jnp.dot(h_bf16, w_ref[layer], preferred_element_type=jnp.float32)
        agg = jnp.dot(a, hw.astype(jnp.bfloat16), preferred_element_type=jnp.float32)
        return agg + b_ref[layer:layer + 1, :]

    res = affine(x, 0)                                       # Linear(in -> h4)
    h = jnp.maximum(graph_conv(x, 1), 0.0)                   # relu(conv1)
    h = jnp.maximum(graph_conv(h.astype(jnp.bfloat16), 2), 0.0)   # relu(conv2)
    h = jnp.maximum(graph_conv(h.astype(jnp.bfloat16), 3), 0.0)   # relu(conv3)
    h = graph_conv(h.astype(jnp.bfloat16), 4)                # conv4 (no relu)
    h = jnp.maximum(h + res, 0.0)                            # relu(conv4 + residual)
    o_ref[...] = affine(h.astype(jnp.bfloat16), 5)           # Linear(h4 -> classes)


def pack_params(params):
    """params = (wr, br, w1, b1, w2, b2, w3, b3, w4, b4, wo, bo), weights stored
    as (in, out) so the kernel computes x @ W;  biases are 1-D (out,).
    Returns (w_pack[6,128,128] bf16, b_pack[8,128] f32), zero-padded to 128 lanes."""
    weights, biases = params[0::2], params[1::2]
    assert len(weights) == NUM_LAYERS
    w_pack = jnp.zeros((NUM_LAYERS, PAD, PAD), jnp.float32)
    b_pack = jnp.zeros((8, PAD), jnp.float32)          # 6 rows used, padded to 8 sublanes
    for i, (w, b) in enumerate(zip(weights, biases)):
        w_pack = w_pack.at[i, : w.shape[0], : w.shape[1]].set(w)
        b_pack = b_pack.at[i, : b.shape[0]].set(b)
    return w_pack.astype(jnp.bfloat16), b_pack


def gcn4_fc_forward(a_hat, x, w_pack, b_pack, num_classes):
    """Fused forward pass.  a_hat: [N,N] f32, x: [N,in_feats] f32."""
    n, in_feats = x.shape
    x_pad = jnp.zeros((n, PAD), jnp.float32).at[:, :in_feats].set(x)
    out_pad = pl.pallas_call(
        gcn4_fc_kernel,
        out_shape=jax.ShapeDtypeStruct((n, PAD), jnp.float32),
        # gridless call: single invocation, all operands fully VMEM-resident.
        # (If N scales to thousands, tile A_hat with BlockSpecs and raise
        #  vmem_limit_bytes — not needed at these sizes.)
    )(a_hat.astype(jnp.bfloat16), x_pad.astype(jnp.bfloat16), w_pack, b_pack)
    return out_pad[:, :num_classes]   # padded logit columns sliced off outside the kernel


def gcn4_fc_reference(a_hat, x, params):
    """Pure-JAX f32 reference of the PyTorch forward (for a sanity check)."""
    wr, br, w1, b1, w2, b2, w3, b3, w4, b4, wo, bo = params
    res = x @ wr + br
    h = jax.nn.relu(a_hat @ (x @ w1) + b1)
    h = jax.nn.relu(a_hat @ (h @ w2) + b2)
    h = jax.nn.relu(a_hat @ (h @ w3) + b3)
    h = a_hat @ (h @ w4) + b4
    h = jax.nn.relu(h + res)
    return h @ wo + bo


def make_params(key, in_feats, h1, h2, h3, h4, num_classes):
    """Deterministic synthetic init (glorot-uniform-ish), weights stored (in, out)."""
    dims = [(in_feats, h4),                                   # residual Linear
            (in_feats, h1), (h1, h2), (h2, h3), (h3, h4),     # conv1..conv4
            (h4, num_classes)]                                # op Linear
    params = []
    for din, dout in dims:
        kw, kb, key = jax.random.split(key, 3)
        scale = (6.0 / (din + dout)) ** 0.5
        w = jax.random.uniform(kw, (din, dout), jnp.float32, -scale, scale)
        b = jax.random.uniform(kb, (dout,), jnp.float32, -0.1, 0.1)
        params.extend([w, b])
    return tuple(params)


def make_graph(key, n):
    """Random undirected graph with self-loops -> dense normalized adjacency."""
    a = (jax.random.uniform(key, (n, n)) < 0.1).astype(jnp.float32)
    a = jnp.maximum(a, a.T)                                  # symmetrize
    a = jnp.maximum(a, jnp.eye(n, dtype=jnp.float32))        # self loops (no zero degree)
    deg = jnp.sum(a, axis=1)
    d_inv_sqrt = 1.0 / jnp.sqrt(deg)
    return a * d_inv_sqrt[:, None] * d_inv_sqrt[None, :]


if __name__ == "__main__":
    key = jax.random.PRNGKey(0)
    k_graph, k_x, k_p = jax.random.split(key, 3)

    N = 64
    in_feats, h1, h2, h3, h4, num_classes = 16, 32, 32, 32, 32, 8

    a_hat = make_graph(k_graph, N)                            # [64, 64]
    x = jax.random.normal(k_x, (N, in_feats), jnp.float32)    # [64, 16]
    params = make_params(k_p, in_feats, h1, h2, h3, h4, num_classes)
    w_pack, b_pack = pack_params(params)                      # packed once, outside forward

    out = gcn4_fc_forward(a_hat, x, w_pack, b_pack, num_classes)
    jax.block_until_ready(out)

    assert out.shape == (N, num_classes)
    assert bool(jnp.all(jnp.isfinite(out)))

    # sanity check against the pure-JAX f32 reference (loose tol: bf16 MXU operands)
    ref = gcn4_fc_reference(a_hat, x, params)
    assert bool(jnp.allclose(out, ref, atol=1e-1, rtol=1e-1))

    print("KERNEL_OK")
</pallas_src>

<mosaic_0001>
module attributes {stable_mosaic.version = 11 : i64} {
  func.func @gcn4_fc_kernel(%arg0: memref<64x64xbf16, #tpu.memory_space<vmem>>, %arg1: memref<64x128xbf16, #tpu.memory_space<vmem>>, %arg2: memref<6x128x128xbf16, #tpu.memory_space<vmem>>, %arg3: memref<8x128xf32, #tpu.memory_space<vmem>>, %arg4: memref<64x128xf32, #tpu.memory_space<vmem>>) attributes {dimension_semantics = [], scalar_prefetch = 0 : i64, scratch_operands = 0 : i64, tpu.core_type = #tpu.core_type<tc>} {
    %c0 = arith.constant 0 : index
    %c0_0 = arith.constant 0 : index
    %0 = vector.load %arg0[%c0, %c0_0] : memref<64x64xbf16, #tpu.memory_space<vmem>>, vector<64x64xbf16>
    %c0_1 = arith.constant 0 : index
    %c0_2 = arith.constant 0 : index
    %1 = vector.load %arg1[%c0_1, %c0_2] : memref<64x128xbf16, #tpu.memory_space<vmem>>, vector<64x128xbf16>
    %c0_3 = arith.constant 0 : index
    %c0_4 = arith.constant 0 : index
    %c0_5 = arith.constant 0 : index
    %2 = vector.load %arg2[%c0_3, %c0_4, %c0_5] : memref<6x128x128xbf16, #tpu.memory_space<vmem>>, vector<1x128x128xbf16>
    %3 = vector.shape_cast %2 : vector<1x128x128xbf16> to vector<128x128xbf16>
    %cst = arith.constant dense<0.000000e+00> : vector<64x128xf32>
    %4 = tpu.matmul %1, %3, %cst {dimension_numbers = #tpu.dot_dimension_numbers<[1], [0], [0], [1], [0, 0, 1, 1], [], []>} : vector<64x128xbf16>, vector<128x128xbf16>, vector<64x128xf32> -> vector<64x128xf32>
    %c0_6 = arith.constant 0 : index
    %c0_7 = arith.constant 0 : index
    %5 = vector.load %arg3[%c0_6, %c0_7] : memref<8x128xf32, #tpu.memory_space<vmem>>, vector<1x128xf32>
    %6 = vector.broadcast %5 : vector<1x128xf32> to vector<64x128xf32>
    %7 = arith.addf %4, %6 : vector<64x128xf32>
    %c1 = arith.constant 1 : index
    %c0_8 = arith.constant 0 : index
    %c0_9 = arith.constant 0 : index
    %8 = vector.load %arg2[%c1, %c0_8, %c0_9] : memref<6x128x128xbf16, #tpu.memory_space<vmem>>, vector<1x128x128xbf16>
    %9 = vector.shape_cast %8 : vector<1x128x128xbf16> to vector<128x128xbf16>
    %cst_10 = arith.constant dense<0.000000e+00> : vector<64x128xf32>
    %10 = tpu.matmul %1, %9, %cst_10 {dimension_numbers = #tpu.dot_dimension_numbers<[1], [0], [0], [1], [0, 0, 1, 1], [], []>} : vector<64x128xbf16>, vector<128x128xbf16>, vector<64x128xf32> -> vector<64x128xf32>
    %11 = arith.truncf %10 : vector<64x128xf32> to vector<64x128xbf16>
    %cst_11 = arith.constant dense<0.000000e+00> : vector<64x128xf32>
    %12 = tpu.matmul %0, %11, %cst_11 {dimension_numbers = #tpu.dot_dimension_numbers<[1], [0], [0], [1], [0, 0, 1, 1], [], []>} : vector<64x64xbf16>, vector<64x128xbf16>, vector<64x128xf32> -> vector<64x128xf32>
    %c1_12 = arith.constant 1 : index
    %c0_13 = arith.constant 0 : index
    %13 = vector.load %arg3[%c1_12, %c0_13] : memref<8x128xf32, #tpu.memory_space<vmem>>, vector<1x128xf32>
    %14 = vector.broadcast %13 : vector<1x128xf32> to vector<64x128xf32>
    %15 = arith.addf %12, %14 : vector<64x128xf32>
    %cst_14 = arith.constant 0.000000e+00 : f32
    %16 = vector.broadcast %cst_14 : f32 to vector<64x128xf32>
    %17 = arith.maximumf %15, %16 : vector<64x128xf32>
    %18 = arith.truncf %17 : vector<64x128xf32> to vector<64x128xbf16>
    %c2 = arith.constant 2 : index
    %c0_15 = arith.constant 0 : index
    %c0_16 = arith.constant 0 : index
    %19 = vector.load %arg2[%c2, %c0_15, %c0_16] : memref<6x128x128xbf16, #tpu.memory_space<vmem>>, vector<1x128x128xbf16>
    %20 = vector.shape_cast %19 : vector<1x128x128xbf16> to vector<128x128xbf16>
    %cst_17 = arith.constant dense<0.000000e+00> : vector<64x128xf32>
    %21 = tpu.matmul %18, %20, %cst_17 {dimension_numbers = #tpu.dot_dimension_numbers<[1], [0], [0], [1], [0, 0, 1, 1], [], []>} : vector<64x128xbf16>, vector<128x128xbf16>, vector<64x128xf32> -> vector<64x128xf32>
    %22 = arith.truncf %21 : vector<64x128xf32> to vector<64x128xbf16>
    %cst_18 = arith.constant dense<0.000000e+00> : vector<64x128xf32>
    %23 = tpu.matmul %0, %22, %cst_18 {dimension_numbers = #tpu.dot_dimension_numbers<[1], [0], [0], [1], [0, 0, 1, 1], [], []>} : vector<64x64xbf16>, vector<64x128xbf16>, vector<64x128xf32> -> vector<64x128xf32>
    %c2_19 = arith.constant 2 : index
    %c0_20 = arith.constant 0 : index
    %24 = vector.load %arg3[%c2_19, %c0_20] : memref<8x128xf32, #tpu.memory_space<vmem>>, vector<1x128xf32>
    %25 = vector.broadcast %24 : vector<1x128xf32> to vector<64x128xf32>
    %26 = arith.addf %23, %25 : vector<64x128xf32>
    %cst_21 = arith.constant 0.000000e+00 : f32
    %27 = vector.broadcast %cst_21 : f32 to vector<64x128xf32>
    %28 = arith.maximumf %26, %27 : vector<64x128xf32>
    %29 = arith.truncf %28 : vector<64x128xf32> to vector<64x128xbf16>
    %c3 = arith.constant 3 : index
    %c0_22 = arith.constant 0 : index
    %c0_23 = arith.constant 0 : index
    %30 = vector.load %arg2[%c3, %c0_22, %c0_23] : memref<6x128x128xbf16, #tpu.memory_space<vmem>>, vector<1x128x128xbf16>
    %31 = vector.shape_cast %30 : vector<1x128x128xbf16> to vector<128x128xbf16>
    %cst_24 = arith.constant dense<0.000000e+00> : vector<64x128xf32>
    %32 = tpu.matmul %29, %31, %cst_24 {dimension_numbers = #tpu.dot_dimension_numbers<[1], [0], [0], [1], [0, 0, 1, 1], [], []>} : vector<64x128xbf16>, vector<128x128xbf16>, vector<64x128xf32> -> vector<64x128xf32>
    %33 = arith.truncf %32 : vector<64x128xf32> to vector<64x128xbf16>
    %cst_25 = arith.constant dense<0.000000e+00> : vector<64x128xf32>
    %34 = tpu.matmul %0, %33, %cst_25 {dimension_numbers = #tpu.dot_dimension_numbers<[1], [0], [0], [1], [0, 0, 1, 1], [], []>} : vector<64x64xbf16>, vector<64x128xbf16>, vector<64x128xf32> -> vector<64x128xf32>
    %c3_26 = arith.constant 3 : index
    %c0_27 = arith.constant 0 : index
    %35 = vector.load %arg3[%c3_26, %c0_27] : memref<8x128xf32, #tpu.memory_space<vmem>>, vector<1x128xf32>
    %36 = vector.broadcast %35 : vector<1x128xf32> to vector<64x128xf32>
    %37 = arith.addf %34, %36 : vector<64x128xf32>
    %cst_28 = arith.constant 0.000000e+00 : f32
    %38 = vector.broadcast %cst_28 : f32 to vector<64x128xf32>
    %39 = arith.maximumf %37, %38 : vector<64x128xf32>
    %40 = arith.truncf %39 : vector<64x128xf32> to vector<64x128xbf16>
    %c4 = arith.constant 4 : index
    %c0_29 = arith.constant 0 : index
    %c0_30 = arith.constant 0 : index
    %41 = vector.load %arg2[%c4, %c0_29, %c0_30] : memref<6x128x128xbf16, #tpu.memory_space<vmem>>, vector<1x128x128xbf16>
    %42 = vector.shape_cast %41 : vector<1x128x128xbf16> to vector<128x128xbf16>
    %cst_31 = arith.constant dense<0.000000e+00> : vector<64x128xf32>
    %43 = tpu.matmul %40, %42, %cst_31 {dimension_numbers = #tpu.dot_dimension_numbers<[1], [0], [0], [1], [0, 0, 1, 1], [], []>} : vector<64x128xbf16>, vector<128x128xbf16>, vector<64x128xf32> -> vector<64x128xf32>
    %44 = arith.truncf %43 : vector<64x128xf32> to vector<64x128xbf16>
    %cst_32 = arith.constant dense<0.000000e+00> : vector<64x128xf32>
    %45 = tpu.matmul %0, %44, %cst_32 {dimension_numbers = #tpu.dot_dimension_numbers<[1], [0], [0], [1], [0, 0, 1, 1], [], []>} : vector<64x64xbf16>, vector<64x128xbf16>, vector<64x128xf32> -> vector<64x128xf32>
    %c4_33 = arith.constant 4 : index
    %c0_34 = arith.constant 0 : index
    %46 = vector.load %arg3[%c4_33, %c0_34] : memref<8x128xf32, #tpu.memory_space<vmem>>, vector<1x128xf32>
    %47 = vector.broadcast %46 : vector<1x128xf32> to vector<64x128xf32>
    %48 = arith.addf %45, %47 : vector<64x128xf32>
    %49 = arith.addf %48, %7 : vector<64x128xf32>
    %cst_35 = arith.constant 0.000000e+00 : f32
    %50 = vector.broadcast %cst_35 : f32 to vector<64x128xf32>
    %51 = arith.maximumf %49, %50 : vector<64x128xf32>
    %52 = arith.truncf %51 : vector<64x128xf32> to vector<64x128xbf16>
    %c5 = arith.constant 5 : index
    %c0_36 = arith.constant 0 : index
    %c0_37 = arith.constant 0 : index
    %53 = vector.load %arg2[%c5, %c0_36, %c0_37] : memref<6x128x128xbf16, #tpu.memory_space<vmem>>, vector<1x128x128xbf16>
    %54 = vector.shape_cast %53 : vector<1x128x128xbf16> to vector<128x128xbf16>
    %cst_38 = arith.constant dense<0.000000e+00> : vector<64x128xf32>
    %55 = tpu.matmul %52, %54, %cst_38 {dimension_numbers = #tpu.dot_dimension_numbers<[1], [0], [0], [1], [0, 0, 1, 1], [], []>} : vector<64x128xbf16>, vector<128x128xbf16>, vector<64x128xf32> -> vector<64x128xf32>
    %c5_39 = arith.constant 5 : index
    %c0_40 = arith.constant 0 : index
    %56 = vector.load %arg3[%c5_39, %c0_40] : memref<8x128xf32, #tpu.memory_space<vmem>>, vector<1x128xf32>
    %57 = vector.broadcast %56 : vector<1x128xf32> to vector<64x128xf32>
    %58 = arith.addf %55, %57 : vector<64x128xf32>
    %c0_41 = arith.constant 0 : index
    %c0_42 = arith.constant 0 : index
    %59 = vector.load %arg4[%c0_41, %c0_42] : memref<64x128xf32, #tpu.memory_space<vmem>>, vector<64x128xf32>
    tpu.vector_store %arg4[%c0_41, %c0_42], %58 {strides = array<i32>} : memref<64x128xf32, #tpu.memory_space<vmem>>, vector<64x128xf32>,
    return
  }
}

</mosaic_0001>

<bundles_post_ra>
// kernel: tpu_custom_call.1
= control target key start
LH: loop header
LB: loop body
LE: loop exit
PB: predicated region body
PF: predicated region fallthrough
CT: control target
= control target key end

     0   :  { %9 = vsyncpa [#allocation3], 0  ;;  %s2039_s0 = inlined_call_operand.hbm [shape: bf16[64,64], index: 0, kind: input, shape index: {}]   ;;  %s2040_s1 = inlined_call_operand.hbm [shape: bf16[64,128], index: 1, kind: input, shape index: {}]   ;;  %s2041_s2 = inlined_call_operand.hbm [shape: bf16[6,128,128], index: 2, kind: input, shape index: {}]   ;;  %s2042_s3 = inlined_call_operand.vmem [shape: f32[8,128], index: 3, kind: input, shape index: {}]   ;;  %s2043_s4 = inlined_call_operand.hbm [shape: f32[64,128], index: 4, kind: output, shape index: {}]  }
   0x1   :  { %10 = vsyncpa [#allocation6], 0 }
   0x2   :  { %11 = vsyncpa [#allocation4], 0  ;;  %s1872_s15 = smov [#allocation5]   ;;  %s1873_s17 = smov [#allocation2]  }
   0x3   :  { %s29_s16 = sshll.u32 %s1872_s15, 4  ;;  %s17_s18 = sshll.u32 %s1873_s17, 4  ;;  %s30_s16 = int_to_ptr.vmem [resolvable:$true] %s29_s16  ;;  %s1905_s18 = int_to_ptr.vmem [resolvable:$true] %s17_s18 }
   0x4   :  { %s1778_s21 = scalar_lea.hbm %s2040_s1, 512 }
   0x5   :  { %p1779_p0 = scmp.ne.s32.totalorder %s2040_s1, %s1778_s21  ;;  %p1782_p1 = scmp.lt.u32.totalorder %s1778_s21, %s2040_s1 }
   0x7   :  { %p1784_p2 = pnand %p1782_p1, %p1779_p0 }
   0x9   :  { %1787 = shalt.err (!%p1784_p2)
}
   0xa   :  { %s1788_s26 = scalar_lea.vmem %s30_s16, 512  ;;  %p1793_p4 = scmp.lt.s32.totalorder %s30_s16, %s30_s16 }
   0xb   :  { %p1789_p3 = scmp.ne.s32.totalorder %s30_s16, %s1788_s26  ;;  %p1794_p5 = scmp.lt.s32.totalorder %s1788_s26, %s1788_s26 }
   0xd   :  { %p1795_p6 = por %p1794_p5, %p1793_p4 }
   0xf   :  { %p1796_p7 = pnand %p1795_p6, %p1789_p3 }
  0x11   :  { %1799 = shalt.err (!%p1796_p7)
}
  0x12   :  { %s1874_s27 = smov 64   ;;  %s1875_s28 = smov 4  }
  0x13   :  { %35 = dma.hbm_to_vmem [thread:$0]  %s2040_s1, 512, %s30_s16, [#allocation6], %s1874_s27, %s1874_s27, %s1875_s28  }
  0x14   :  { %s1800_s7 = scalar_lea.hbm %s2039_s0, 512 }
  0x15   :  { %p1801_p8 = scmp.ne.s32.totalorder %s2039_s0, %s1800_s7  ;;  %p1804_p9 = scmp.lt.u32.totalorder %s1800_s7, %s2039_s0 }
  0x17   :  { %p1806_p10 = pnand %p1804_p9, %p1801_p8 }
  0x19   :  { %1809 = shalt.err (!%p1806_p10)
}
  0x1a   :  { %s1810_s12 = scalar_lea.vmem %s1905_s18, 512  ;;  %p1815_p12 = scmp.lt.s32.totalorder %s1905_s18, %s1905_s18 }
  0x1b   :  { %p1811_p11 = scmp.ne.s32.totalorder %s1905_s18, %s1810_s12  ;;  %p1816_p13 = scmp.lt.s32.totalorder %s1810_s12, %s1810_s12 }
  0x1d   :  { %p1817_p0 = por %p1816_p13, %p1815_p12 }
  0x1f   :  { %p1818_p1 = pnand %p1817_p0, %p1811_p11 }
  0x21   :  { %1821 = shalt.err (!%p1818_p1)
}
  0x22   :  { %23 = dma.hbm_to_vmem [thread:$0]  %s2039_s0, 512, %s1905_s18, [#allocation3], %s1874_s27, %s1874_s27, %s1875_s28  }
  0x23   :  { %s1876_s14 = smov [#allocation7]   ;;  %s1822_s19 = scalar_lea.hbm %s2041_s2, 6144 }
  0x24   :  { %s41_s15 = sshll.u32 %s1876_s14, 4  ;;  %p1823_p2 = scmp.ne.s32.totalorder %s2041_s2, %s1822_s19  ;;  %s42_s15 = int_to_ptr.vmem [resolvable:$true] %s41_s15 }
  0x25   :  { %p1826_p3 = scmp.lt.u32.totalorder %s1822_s19, %s2041_s2 }
  0x27   :  { %p1828_p4 = pnand %p1826_p3, %p1823_p2 }
  0x29   :  { %1831 = shalt.err (!%p1828_p4)
}
  0x2a   :  { %s1832_s24 = scalar_lea.vmem %s42_s15, 6144  ;;  %p1837_p6 = scmp.lt.s32.totalorder %s42_s15, %s42_s15 }
  0x2b   :  { %p1833_p5 = scmp.ne.s32.totalorder %s42_s15, %s1832_s24  ;;  %p1838_p7 = scmp.lt.s32.totalorder %s1832_s24, %s1832_s24 }
  0x2d   :  { %p1839_p8 = por %p1838_p7, %p1837_p6 }
  0x2f   :  { %p1840_p9 = pnand %p1839_p8, %p1833_p5 }
  0x31   :  { %1843 = shalt.err (!%p1840_p9)
}
  0x32   :  { %47 = dma.hbm_to_vmem [thread:$0]  %s2041_s2, 6144, %s42_s15, [#allocation6], %s1874_s27, %s1874_s27, %s1875_s28  }
  0x33   :  { %1866 = dma.done.wait [#allocation3], 512  }
  0x34   :  { %1867 = vsyncadd [#allocation3], 4294966784 }
  0x35   :  { %1868 = dma.done.wait [#allocation6], 6656  }
  0x36   :  { %1869 = vsyncadd [#allocation6], 4294960640  ;;  %v1722_v0 = vld [vmem:[#allocation7 + $0x40] sm:$0xff]   ;;  %v1723_v1 = vld [vmem:[#allocation7 + $0x48] sm:$0xff]   ;;  %vm393_vm0 = vcmask 523264   ;;  %s1877_s10 = smov [#allocation8]  }
  0x37   :  { %1506 = vmatprep.subr.bf16.mxu1 %v1722_v0  ;;  %v1724_v2 = vld [vmem:[#allocation7 + $0x50] sm:$0xff]   ;;  %v1725_v3 = vld [vmem:[#allocation7 + $0x58] sm:$0xff]   ;;  %v1730_v4 = vld [vmem:[#allocation5] sm:$0xff]   ;;  %s1287_s11 = sshll.u32 %s1877_s10, 4  ;;  %s1288_s11 = int_to_ptr.vmem [resolvable:$true] %s1287_s11 }
  0x38   :  { %1507 = vmatpush3.bf16.msra.mxu1 %v1722_v0  ;;  %1522 = vmatprep.mubr.bf16.mxu1 %v1730_v4  ;;  %v1726_v5 = vld [vmem:[#allocation7 + $0x60] sm:$0xff]   ;;  %v1727_v6 = vld [vmem:[#allocation7 + $0x68] sm:$0xff]   ;;  %v1728_v7 = vld [vmem:[#allocation7 + $0x70] sm:$0xff]   ;;  %p1849_p11 = scmp.lt.s32.totalorder %s1288_s11, %s1288_s11 }
  0x39   :  { %1508 = vmatprep.subr.bf16.mxu1 %v1723_v1  ;;  %1498 = vmatprep.mubr.bf16.mxu0 %v1730_v4  ;;  %v1729_v8 = vld [vmem:[#allocation7 + $0x78] sm:$0xff]   ;;  %v1957_v9 = vld [vmem:[#allocation5 + $0x8] sm:$0xff]   ;;  %v1959_v10 = vld [vmem:[#allocation5 + $0x10] sm:$0xff]  }
  0x3a   :  { %v1963_v11 = vld [vmem:[#allocation5 + $0x18] sm:$0xff]   ;;  %v1966_v12 = vld [vmem:[#allocation2] sm:$0xff]   ;;  %v1970_v26 = vld [vmem:[#allocation2 + $0x8] sm:$0xff]  }
  0x3b   :  { %v1738_v25 = vld [vmem:[#allocation7 + $0x80] sm:$0xff]   ;;  %v1972_v27 = vld [vmem:[#allocation2 + $0x10] sm:$0xff]   ;;  %v1739_v28 = vld [vmem:[#allocation7 + $0x88] sm:$0xff]  }
  0x3c   :  { %1509 = vmatpush3.bf16.msra.mxu1 %v1723_v1  ;;  %v1740_v29 = vld [vmem:[#allocation7 + $0x90] sm:$0xff]   ;;  %v1978_v30 = vld [vmem:[#allocation2 + $0x18] sm:$0xff]   ;;  %v1742_v32 = vld [vmem:[#allocation7 + $0xa0] sm:$0xff]  }
  0x3d   :  { %1510 = vmatprep.subr.bf16.mxu1 %v1724_v2  ;;  %v1741_v31 = vld [vmem:[#allocation7 + $0x98] sm:$0xff]   ;;  %v1743_v33 = vld [vmem:[#allocation7 + $0xa8] sm:$0xff]   ;;  %v1744_v34 = vld [vmem:[#allocation7 + $0xb0] sm:$0xff]  }
  0x3e   :  { %v1745_v35 = vld [vmem:[#allocation7 + $0xb8] sm:$0xff]   ;;  %v1746_v36 = vld [vmem:[#allocation7] sm:$0xff]   ;;  %v1747_v37 = vld [vmem:[#allocation7 + $0x8] sm:$0xff]  }
  0x3f   :  { %1482 = vmatprep.subr.bf16.mxu0 %v1746_v36  ;;  %v1748_v38 = vld [vmem:[#allocation7 + $0x10] sm:$0xff]   ;;  %v1749_v39 = vld [vmem:[#allocation7 + $0x18] sm:$0xff]   ;;  %v1750_v40 = vld [vmem:[#allocation7 + $0x20] sm:$0xff]  }
  0x40   :  { %1511 = vmatpush3.bf16.msra.mxu1 %v1724_v2  ;;  %1483 = vmatpush3.bf16.msra.mxu0 %v1746_v36  ;;  %v1751_v41 = vld [vmem:[#allocation7 + $0x28] sm:$0xff]   ;;  %v1752_v42 = vld [vmem:[#allocation7 + $0x30] sm:$0xff]   ;;  %v1321_v43 = vld [vmem:[%s2042_s3 + $0x1] ss:$0 sm:$0xff] }
  0x41   :  { %1512 = vmatprep.subr.bf16.mxu1 %v1725_v3  ;;  %1484 = vmatprep.subr.bf16.mxu0 %v1747_v37 }
  0x44   :  { %1513 = vmatpush3.bf16.msra.mxu1 %v1725_v3  ;;  %1485 = vmatpush3.bf16.msra.mxu0 %v1747_v37 }
  0x45   :  { %1514 = vmatprep.subr.bf16.mxu1 %v1726_v5  ;;  %1486 = vmatprep.subr.bf16.mxu0 %v1748_v38 }
  0x48   :  { %1515 = vmatpush3.bf16.msra.mxu1 %v1726_v5  ;;  %1487 = vmatpush3.bf16.msra.mxu0 %v1748_v38 }
  0x49   :  { %1516 = vmatprep.subr.bf16.mxu1 %v1727_v6  ;;  %1488 = vmatprep.subr.bf16.mxu0 %v1749_v39 }
  0x4c   :  { %1517 = vmatpush3.bf16.msra.mxu1 %v1727_v6  ;;  %1489 = vmatpush3.bf16.msra.mxu0 %v1749_v39 }
  0x4d   :  { %1518 = vmatprep.subr.bf16.mxu1 %v1728_v7  ;;  %1490 = vmatprep.subr.bf16.mxu0 %v1750_v40 }
  0x50   :  { %1519 = vmatpush3.bf16.msra.mxu1 %v1728_v7  ;;  %1491 = vmatpush3.bf16.msra.mxu0 %v1750_v40 }
  0x51   :  { %1520 = vmatprep.subr.bf16.mxu1 %v1729_v8  ;;  %1492 = vmatprep.subr.bf16.mxu0 %v1751_v41 }
  0x54   :  { %1521 = vmatpush3.bf16.msra.mxu1 %v1729_v8  ;;  %1493 = vmatpush3.bf16.msra.mxu0 %v1751_v41  ;;  %v1753_v8 = vld [vmem:[#allocation7 + $0x38] sm:$0xff]  }
  0x55   :  { %1494 = vmatprep.subr.bf16.mxu0 %v1752_v42 }
  0x57   :  { %1523 = vmatmul.mubr.bf16.vlgmr.msra.gmra.mrb[0].mxu1 %v1957_v9 }
  0x58   :  { %1526 = vmatprep.mubr.bf16.mxu1 %v1959_v10  ;;  %1495 = vmatpush3.bf16.msra.mxu0 %v1752_v42 }
  0x59   :  { %1496 = vmatprep.subr.bf16.mxu0 %v1753_v8 }
  0x5c   :  { %1497 = vmatpush3.bf16.msra.mxu0 %v1753_v8 }
  0x5f   :  { %1527 = vmatmul.mubr.bf16.gmra.mrb[4].mxu1 %v1963_v11  ;;  %1499 = vmatmul.mubr.bf16.vlgmr.msra.gmra.mrb[0].mxu0 %v1957_v9 }
  0x60   :  { %1538 = vmatprep.mubr.msk.bf16.mxu1 %vm393_vm0, %v1966_v12  ;;  %1502 = vmatprep.mubr.bf16.mxu0 %v1959_v10 }
  0x67   :  { %1503 = vmatmul.mubr.bf16.gmra.mrb[4].mxu0 %v1963_v11  ;;  %v1754_v11 = vld [vmem:[#allocation7 + $0xc0] sm:$0xff]  }
  0x68   :  { %1578 = vmatprep.mubr.msk.bf16.mxu0 %vm393_vm0, %v1966_v12 }
 0x12a   :  { %v1524_v13 = vpop.f32.mrb[0].mxu1 }
 0x12b   :  { %v333_v14 = vpop.f32.mrb[1].mxu1 }
 0x12c   :  { %v1525_v15 = vpop.f32.mrb[2].mxu1 }
 0x12d   :  { %v365_v16 = vpack.c.bf16 %v1525_v15, %v1524_v13  ;;  %v336_v17 = vpop.f32.mrb[3].mxu1 }
 0x12e   :  { %v364_v18 = vpack.c.bf16 %v336_v17, %v333_v14 }
 0x130   :  { %1530 = vmatprep.subr.bf16.mxu1 %v364_v18 }
 0x131   :  { %1531 = vmatpush3.bf16.msra.mxu1 %v364_v18 }
 0x132   :  { %v1528_v19 = vpop.f32.mrb[4].mxu1  ;;  %1532 = vmatprep.subr.bf16.mxu1 %v365_v16 }
 0x133   :  { %v349_v20 = vpop.f32.mrb[5].mxu1 }
 0x134   :  { %v1529_v21 = vpop.f32.mrb[6].mxu1 }
 0x135   :  { %v367_v22 = vpack.c.bf16 %v1529_v21, %v1528_v19  ;;  %v352_v23 = vpop.f32.mrb[7].mxu1  ;;  %1533 = vmatpush3.bf16.msra.mxu1 %v365_v16 }
 0x136   :  { %v366_v24 = vpack.c.bf16 %v352_v23, %v349_v20  ;;  %v1755_v23 = vld [vmem:[#allocation7 + $0xc8] sm:$0xff]  }
 0x138   :  { %1534 = vmatprep.subr.bf16.mxu1 %v366_v24 }
 0x139   :  { %1535 = vmatpush3.bf16.msra.mxu1 %v366_v24  ;;  %v1756_v24 = vld [vmem:[#allocation7 + $0xd0] sm:$0xff]  }
 0x13a   :  { %1536 = vmatprep.subr.bf16.mxu1 %v367_v22 }
 0x13d   :  { %1537 = vmatpush3.bf16.msra.mxu1 %v367_v22 }
 0x13e   :  { %1546 = vmatprep.subr.bf16.mxu1 %v1738_v25 }
 0x140   :  { %1539 = vmatmul.mubr.msk.bf16.vlgmr.msra.gmra.mrb[8].mxu1 %vm393_vm0, %v1970_v26 }
 0x141   :  { %1542 = vmatprep.mubr.msk.bf16.mxu1 %vm393_vm0, %v1972_v27  ;;  %1547 = vmatpush3.bf16.msra.mxu1 %v1738_v25  ;;  %v1757_v25 = vld [vmem:[#allocation7 + $0xd8] sm:$0xff]  }
 0x142   :  { %1548 = vmatprep.subr.bf16.mxu1 %v1739_v28 }
 0x145   :  { %1549 = vmatpush3.bf16.msra.mxu1 %v1739_v28  ;;  %v1758_v28 = vld [vmem:[#allocation7 + $0xe0] sm:$0xff]  }
 0x146   :  { %1550 = vmatprep.subr.bf16.mxu1 %v1740_v29 }
 0x148   :  { %1543 = vmatmul.mubr.msk.bf16.gmra.mrb[12].mxu1 %vm393_vm0, %v1978_v30 }
 0x149   :  { %1551 = vmatpush3.bf16.msra.mxu1 %v1740_v29  ;;  %v1759_v29 = vld [vmem:[#allocation7 + $0xe8] sm:$0xff]  }
 0x14a   :  { %1552 = vmatprep.subr.bf16.mxu1 %v1741_v31 }
 0x14d   :  { %1553 = vmatpush3.bf16.msra.mxu1 %v1741_v31  ;;  %v1760_v31 = vld [vmem:[#allocation7 + $0xf0] sm:$0xff]  }
 0x14e   :  { %1554 = vmatprep.subr.bf16.mxu1 %v1742_v32 }
 0x151   :  { %1555 = vmatpush3.bf16.msra.mxu1 %v1742_v32  ;;  %v1761_v32 = vld [vmem:[#allocation7 + $0xf8] sm:$0xff]  }
 0x152   :  { %1556 = vmatprep.subr.bf16.mxu1 %v1743_v33 }
 0x155   :  { %1557 = vmatpush3.bf16.msra.mxu1 %v1743_v33  ;;  %v1338_v33 = vld [vmem:[%s2042_s3 + $0x2] ss:$0 sm:$0xff] }
 0x156   :  { %1558 = vmatprep.subr.bf16.mxu1 %v1744_v34 }
 0x159   :  { %1559 = vmatpush3.bf16.msra.mxu1 %v1744_v34 }
 0x15a   :  { %1560 = vmatprep.subr.bf16.mxu1 %v1745_v35 }
 0x15d   :  { %1561 = vmatpush3.bf16.msra.mxu1 %v1745_v35 }
 0x213   :  { %v1540_v44 = vpop.f32.mrb[8].mxu1 }
 0x214   :  { %v449_v45 = vadd.f32 %v1540_v44, %v1321_v43  ;;  %v440_v46 = vpop.f32.mrb[9].mxu1 }
 0x215   :  { %v441_v47 = vadd.f32 %v1321_v43, %v440_v46  ;;  %v1541_v48 = vpop.f32.mrb[10].mxu1 }
 0x216   :  { %v452_v49 = vadd.f32 %v1541_v48, %v1321_v43  ;;  %v443_v50 = vpop.f32.mrb[11].mxu1  ;;  %v473_v52 = vmax.f32 %v449_v45, 0.0 }
 0x217   :  { %v444_v51 = vadd.f32 %v1321_v43, %v443_v50  ;;  %v471_v54 = vmax.f32 %v441_v47, 0.0 }
 0x218   :  { %v474_v53 = vmax.f32 %v452_v49, 0.0 }
 0x219   :  { %v472_v55 = vmax.f32 %v444_v51, 0.0 }
 0x21a   :  { %v480_v56 = vpack.c.bf16 %v474_v53, %v473_v52 }
 0x21b   :  { %v479_v57 = vpack.c.bf16 %v472_v55, %v471_v54  ;;  %v1544_v58 = vpop.f32.mrb[12].mxu1 }
 0x21c   :  { %v465_v59 = vadd.f32 %v1544_v58, %v1321_v43  ;;  %v456_v60 = vpop.f32.mrb[13].mxu1 }
 0x21d   :  { %v457_v61 = vadd.f32 %v1321_v43, %v456_v60  ;;  %v1545_v62 = vpop.f32.mrb[14].mxu1  ;;  %1562 = vmatprep.mubr.bf16.mxu1 %v479_v57 }
 0x21e   :  { %v468_v63 = vadd.f32 %v1545_v62, %v1321_v43  ;;  %v459_v0 = vpop.f32.mrb[15].mxu1  ;;  %1563 = vmatmul.mubr.bf16.vlgmr.msra.gmra.mrb[16].mxu1 %v480_v56  ;;  %v477_v2 = vmax.f32 %v465_v59, 0.0 }
 0x21f   :  { %v460_v1 = vadd.f32 %v1321_v43, %v459_v0  ;;  %v475_v4 = vmax.f32 %v457_v61, 0.0 }
 0x220   :  { %v478_v3 = vmax.f32 %v468_v63, 0.0 }
 0x221   :  { %v476_v5 = vmax.f32 %v460_v1, 0.0 }
 0x222   :  { %v482_v6 = vpack.c.bf16 %v478_v3, %v477_v2 }
 0x223   :  { %v481_v7 = vpack.c.bf16 %v476_v5, %v475_v4 }
 0x225   :  { %1566 = vmatprep.mubr.bf16.mxu1 %v481_v7 }
 0x226   :  { %1567 = vmatmul.mubr.bf16.gmra.mrb[20].mxu1 %v482_v6 }
 0x227   :  { %1618 = vmatprep.mubr.msk.bf16.mxu1 %vm393_vm0, %v1966_v12 }
 0x2f1   :  { %v1564_v13 = vpop.f32.mrb[16].mxu1 }
 0x2f2   :  { %v582_v14 = vpop.f32.mrb[17].mxu1 }
 0x2f3   :  { %v1565_v15 = vpop.f32.mrb[18].mxu1 }
 0x2f4   :  { %v614_v16 = vpack.c.bf16 %v1565_v15, %v1564_v13  ;;  %v585_v17 = vpop.f32.mrb[19].mxu1  ;;  %v1764_v15 = vld [vmem:[#allocation7 + $0x110] sm:$0xff]  }
 0x2f5   :  { %v613_v18 = vpack.c.bf16 %v585_v17, %v582_v14  ;;  %v1763_v14 = vld [vmem:[#allocation7 + $0x108] sm:$0xff]   ;;  %v1766_v17 = vld [vmem:[#allocation7 + $0x120] sm:$0xff]  }
 0x2f7   :  { %1570 = vmatprep.subr.bf16.mxu0 %v613_v18 }
 0x2f8   :  { %1571 = vmatpush3.bf16.msra.mxu0 %v613_v18  ;;  %v1767_v18 = vld [vmem:[#allocation7 + $0x128] sm:$0xff]  }
 0x2f9   :  { %v1568_v19 = vpop.f32.mrb[20].mxu1  ;;  %1572 = vmatprep.subr.bf16.mxu0 %v614_v16 }
 0x2fa   :  { %v598_v20 = vpop.f32.mrb[21].mxu1 }
 0x2fb   :  { %v1569_v21 = vpop.f32.mrb[22].mxu1 }
 0x2fc   :  { %v616_v9 = vpack.c.bf16 %v1569_v21, %v1568_v19  ;;  %v601_v22 = vpop.f32.mrb[23].mxu1  ;;  %1573 = vmatpush3.bf16.msra.mxu0 %v614_v16  ;;  %v1765_v16 = vld [vmem:[#allocation7 + $0x118] sm:$0xff]   ;;  %v1768_v19 = vld [vmem:[#allocation7 + $0x130] sm:$0xff]   ;;  %v1351_v21 = vld [vmem:[%s2042_s3 + $0x3] ss:$0 sm:$0xff] }
 0x2fd   :  { %v615_v10 = vpack.c.bf16 %v601_v22, %v598_v20  ;;  %v1769_v20 = vld [vmem:[#allocation7 + $0x138] sm:$0xff]  }
 0x2ff   :  { %1574 = vmatprep.subr.bf16.mxu0 %v615_v10 }
 0x300   :  { %1575 = vmatpush3.bf16.msra.mxu0 %v615_v10 }
 0x301   :  { %1576 = vmatprep.subr.bf16.mxu0 %v616_v9 }
 0x304   :  { %1577 = vmatpush3.bf16.msra.mxu0 %v616_v9 }
 0x305   :  { %1586 = vmatprep.subr.bf16.mxu0 %v1754_v11 }
 0x307   :  { %1579 = vmatmul.mubr.msk.bf16.vlgmr.msra.gmra.mrb[8].mxu0 %vm393_vm0, %v1970_v26 }
 0x308   :  { %1582 = vmatprep.mubr.msk.bf16.mxu0 %vm393_vm0, %v1972_v27  ;;  %1587 = vmatpush3.bf16.msra.mxu0 %v1754_v11 }
 0x309   :  { %1588 = vmatprep.subr.bf16.mxu0 %v1755_v23 }
 0x30c   :  { %1589 = vmatpush3.bf16.msra.mxu0 %v1755_v23 }
 0x30d   :  { %1590 = vmatprep.subr.bf16.mxu0 %v1756_v24 }
 0x30f   :  { %1583 = vmatmul.mubr.msk.bf16.gmra.mrb[12].mxu0 %vm393_vm0, %v1978_v30 }
 0x310   :  { %1591 = vmatpush3.bf16.msra.mxu0 %v1756_v24 }
 0x311   :  { %1592 = vmatprep.subr.bf16.mxu0 %v1757_v25 }
 0x314   :  { %1593 = vmatpush3.bf16.msra.mxu0 %v1757_v25 }
 0x315   :  { %1594 = vmatprep.subr.bf16.mxu0 %v1758_v28 }
 0x318   :  { %1595 = vmatpush3.bf16.msra.mxu0 %v1758_v28 }
 0x319   :  { %1596 = vmatprep.subr.bf16.mxu0 %v1759_v29 }
 0x31c   :  { %1597 = vmatpush3.bf16.msra.mxu0 %v1759_v29 }
 0x31d   :  { %1598 = vmatprep.subr.bf16.mxu0 %v1760_v31 }
 0x320   :  { %1599 = vmatpush3.bf16.msra.mxu0 %v1760_v31 }
 0x321   :  { %1600 = vmatprep.subr.bf16.mxu0 %v1761_v32 }
 0x324   :  { %1601 = vmatpush3.bf16.msra.mxu0 %v1761_v32 }
 0x3da   :  { %v1580_v34 = vpop.f32.mrb[8].mxu0 }
 0x3db   :  { %v665_v35 = vadd.f32 %v1580_v34, %v1338_v33  ;;  %v656_v36 = vpop.f32.mrb[9].mxu0 }
 0x3dc   :  { %v657_v37 = vadd.f32 %v1338_v33, %v656_v36  ;;  %v1581_v38 = vpop.f32.mrb[10].mxu0 }
 0x3dd   :  { %v668_v39 = vadd.f32 %v1581_v38, %v1338_v33  ;;  %v659_v40 = vpop.f32.mrb[11].mxu0  ;;  %v689_v42 = vmax.f32 %v665_v35, 0.0 }
 0x3de   :  { %v660_v41 = vadd.f32 %v1338_v33, %v659_v40  ;;  %v687_v44 = vmax.f32 %v657_v37, 0.0 }
 0x3df   :  { %v690_v43 = vmax.f32 %v668_v39, 0.0 }
 0x3e0   :  { %v688_v45 = vmax.f32 %v660_v41, 0.0 }
 0x3e1   :  { %v696_v46 = vpack.c.bf16 %v690_v43, %v689_v42 }
 0x3e2   :  { %v695_v47 = vpack.c.bf16 %v688_v45, %v687_v44  ;;  %v1584_v48 = vpop.f32.mrb[12].mxu0 }
 0x3e3   :  { %v681_v49 = vadd.f32 %v1584_v48, %v1338_v33  ;;  %v672_v50 = vpop.f32.mrb[13].mxu0 }
 0x3e4   :  { %v673_v51 = vadd.f32 %v1338_v33, %v672_v50  ;;  %v1585_v52 = vpop.f32.mrb[14].mxu0  ;;  %1602 = vmatprep.mubr.bf16.mxu0 %v695_v47 }
 0x3e5   :  { %v684_v53 = vadd.f32 %v1585_v52, %v1338_v33  ;;  %v675_v54 = vpop.f32.mrb[15].mxu0  ;;  %1603 = vmatmul.mubr.bf16.vlgmr.msra.gmra.mrb[16].mxu0 %v696_v46  ;;  %v693_v56 = vmax.f32 %v681_v49, 0.0 }
 0x3e6   :  { %v676_v55 = vadd.f32 %v1338_v33, %v675_v54  ;;  %v691_v58 = vmax.f32 %v673_v51, 0.0 }
 0x3e7   :  { %v694_v57 = vmax.f32 %v684_v53, 0.0 }
 0x3e8   :  { %v692_v59 = vmax.f32 %v676_v55, 0.0 }
 0x3e9   :  { %v698_v60 = vpack.c.bf16 %v694_v57, %v693_v56 }
 0x3ea   :  { %v697_v61 = vpack.c.bf16 %v692_v59, %v691_v58 }
 0x3ec   :  { %1606 = vmatprep.mubr.bf16.mxu0 %v697_v61 }
 0x3ed   :  { %1607 = vmatmul.mubr.bf16.gmra.mrb[20].mxu0 %v698_v60 }
 0x3ee   :  { %1658 = vmatprep.mubr.msk.bf16.mxu0 %vm393_vm0, %v1966_v12  ;;  %v1762_v12 = vld [vmem:[#allocation7 + $0x100] sm:$0xff]  }
 0x4b8   :  { %v1604_v62 = vpop.f32.mrb[16].mxu0 }
 0x4b9   :  { %v798_v63 = vpop.f32.mrb[17].mxu0 }
 0x4ba   :  { %v1605_v0 = vpop.f32.mrb[18].mxu0 }
 0x4bb   :  { %v830_v1 = vpack.c.bf16 %v1605_v0, %v1604_v62  ;;  %v801_v2 = vpop.f32.mrb[19].mxu0  ;;  %v1770_v62 = vld [vmem:[#allocation7 + $0x140] sm:$0xff]   ;;  %v1772_v0 = vld [vmem:[#allocation7 + $0x150] sm:$0xff]  }
 0x4bc   :  { %v829_v3 = vpack.c.bf16 %v801_v2, %v798_v63  ;;  %v1771_v63 = vld [vmem:[#allocation7 + $0x148] sm:$0xff]   ;;  %v1774_v2 = vld [vmem:[#allocation7 + $0x160] sm:$0xff]  }
 0x4be   :  { %1610 = vmatprep.subr.bf16.mxu1 %v829_v3 }
 0x4bf   :  { %1611 = vmatpush3.bf16.msra.mxu1 %v829_v3  ;;  %v1775_v3 = vld [vmem:[#allocation7 + $0x168] sm:$0xff]  }
 0x4c0   :  { %v1608_v4 = vpop.f32.mrb[20].mxu0  ;;  %1612 = vmatprep.subr.bf16.mxu1 %v830_v1 }
 0x4c1   :  { %v814_v5 = vpop.f32.mrb[21].mxu0 }
 0x4c2   :  { %v1609_v6 = vpop.f32.mrb[22].mxu0 }
 0x4c3   :  { %v832_v7 = vpack.c.bf16 %v1609_v6, %v1608_v4  ;;  %v817_v8 = vpop.f32.mrb[23].mxu0  ;;  %1613 = vmatpush3.bf16.msra.mxu1 %v830_v1  ;;  %v1773_v1 = vld [vmem:[#allocation7 + $0x158] sm:$0xff]   ;;  %v1300_v4 = vld [vmem:[%s2042_s3] ss:$0 sm:$0xff] }
 0x4c4   :  { %v831_v13 = vpack.c.bf16 %v817_v8, %v814_v5 }
 0x4c6   :  { %1614 = vmatprep.subr.bf16.mxu1 %v831_v13 }
 0x4c7   :  { %1615 = vmatpush3.bf16.msra.mxu1 %v831_v13 }
 0x4c8   :  { %1616 = vmatprep.subr.bf16.mxu1 %v832_v7 }
 0x4cb   :  { %1617 = vmatpush3.bf16.msra.mxu1 %v832_v7 }
 0x4cc   :  { %1626 = vmatprep.subr.bf16.mxu1 %v1762_v12 }
 0x4ce   :  { %1619 = vmatmul.mubr.msk.bf16.vlgmr.msra.gmra.mrb[24].mxu1 %vm393_vm0, %v1970_v26 }
 0x4cf   :  { %1622 = vmatprep.mubr.msk.bf16.mxu1 %vm393_vm0, %v1972_v27  ;;  %1627 = vmatpush3.bf16.msra.mxu1 %v1762_v12 }
 0x4d0   :  { %1628 = vmatprep.subr.bf16.mxu1 %v1763_v14 }
 0x4d3   :  { %1629 = vmatpush3.bf16.msra.mxu1 %v1763_v14 }
 0x4d4   :  { %1630 = vmatprep.subr.bf16.mxu1 %v1764_v15 }
 0x4d6   :  { %1623 = vmatmul.mubr.msk.bf16.gmra.mrb[28].mxu1 %vm393_vm0, %v1978_v30 }
 0x4d7   :  { %1631 = vmatpush3.bf16.msra.mxu1 %v1764_v15 }
 0x4d8   :  { %1632 = vmatprep.subr.bf16.mxu1 %v1765_v16 }
 0x4db   :  { %1633 = vmatpush3.bf16.msra.mxu1 %v1765_v16 }
 0x4dc   :  { %1634 = vmatprep.subr.bf16.mxu1 %v1766_v17 }
 0x4df   :  { %1635 = vmatpush3.bf16.msra.mxu1 %v1766_v17 }
 0x4e0   :  { %1636 = vmatprep.subr.bf16.mxu1 %v1767_v18 }
 0x4e3   :  { %1637 = vmatpush3.bf16.msra.mxu1 %v1767_v18 }
 0x4e4   :  { %1638 = vmatprep.subr.bf16.mxu1 %v1768_v19 }
 0x4e7   :  { %1639 = vmatpush3.bf16.msra.mxu1 %v1768_v19 }
 0x4e8   :  { %1640 = vmatprep.subr.bf16.mxu1 %v1769_v20 }
 0x4eb   :  { %1641 = vmatpush3.bf16.msra.mxu1 %v1769_v20 }
 0x5a1   :  { %v1620_v9 = vpop.f32.mrb[24].mxu1 }
 0x5a2   :  { %v881_v22 = vadd.f32 %v1620_v9, %v1351_v21  ;;  %v872_v10 = vpop.f32.mrb[25].mxu1 }
 0x5a3   :  { %v873_v11 = vadd.f32 %v1351_v21, %v872_v10  ;;  %v1621_v23 = vpop.f32.mrb[26].mxu1 }
 0x5a4   :  { %v884_v24 = vadd.f32 %v1621_v23, %v1351_v21  ;;  %v875_v25 = vpop.f32.mrb[27].mxu1  ;;  %v905_v29 = vmax.f32 %v881_v22, 0.0 }
 0x5a5   :  { %v876_v28 = vadd.f32 %v1351_v21, %v875_v25  ;;  %v903_v32 = vmax.f32 %v873_v11, 0.0 }
 0x5a6   :  { %v906_v31 = vmax.f32 %v884_v24, 0.0 }
 0x5a7   :  { %v904_v33 = vmax.f32 %v876_v28, 0.0 }
 0x5a8   :  { %v912_v34 = vpack.c.bf16 %v906_v31, %v905_v29 }
 0x5a9   :  { %v911_v35 = vpack.c.bf16 %v904_v33, %v903_v32  ;;  %v1624_v36 = vpop.f32.mrb[28].mxu1 }
 0x5aa   :  { %v897_v37 = vadd.f32 %v1624_v36, %v1351_v21  ;;  %v888_v38 = vpop.f32.mrb[29].mxu1 }
 0x5ab   :  { %v889_v39 = vadd.f32 %v1351_v21, %v888_v38  ;;  %v1625_v40 = vpop.f32.mrb[30].mxu1  ;;  %1642 = vmatprep.mubr.bf16.mxu1 %v911_v35 }
 0x5ac   :  { %v900_v41 = vadd.f32 %v1625_v40, %v1351_v21  ;;  %v891_v42 = vpop.f32.mrb[31].mxu1  ;;  %1643 = vmatmul.mubr.bf16.vlgmr.msra.gmra.mrb[32].mxu1 %v912_v34  ;;  %v909_v44 = vmax.f32 %v897_v37, 0.0 }
 0x5ad   :  { %v892_v43 = vadd.f32 %v1351_v21, %v891_v42  ;;  %v907_v46 = vmax.f32 %v889_v39, 0.0  ;;  %v1369_v39 = vld [vmem:[%s2042_s3 + $0x5] ss:$0 sm:$0xff] }
 0x5ae   :  { %v910_v45 = vmax.f32 %v900_v41, 0.0 }
 0x5af   :  { %v908_v47 = vmax.f32 %v892_v43, 0.0 }
 0x5b0   :  { %v914_v48 = vpack.c.bf16 %v910_v45, %v909_v44 }
 0x5b1   :  { %v913_v49 = vpack.c.bf16 %v908_v47, %v907_v46 }
 0x5b3   :  { %1646 = vmatprep.mubr.bf16.mxu1 %v913_v49 }
 0x5b4   :  { %1647 = vmatmul.mubr.bf16.gmra.mrb[36].mxu1 %v914_v48 }
 0x67f   :  { %v1644_v50 = vpop.f32.mrb[32].mxu1 }
 0x680   :  { %v1014_v51 = vpop.f32.mrb[33].mxu1 }
 0x681   :  { %v1645_v52 = vpop.f32.mrb[34].mxu1 }
 0x682   :  { %v1046_v53 = vpack.c.bf16 %v1645_v52, %v1644_v50  ;;  %v1017_v54 = vpop.f32.mrb[35].mxu1 }
 0x683   :  { %v1045_v55 = vpack.c.bf16 %v1017_v54, %v1014_v51 }
 0x685   :  { %1650 = vmatprep.subr.bf16.mxu0 %v1045_v55 }
 0x686   :  { %1651 = vmatpush3.bf16.msra.mxu0 %v1045_v55 }
 0x687   :  { %v1648_v56 = vpop.f32.mrb[36].mxu1  ;;  %1652 = vmatprep.subr.bf16.mxu0 %v1046_v53 }
 0x688   :  { %v1030_v57 = vpop.f32.mrb[37].mxu1 }
 0x689   :  { %v1649_v58 = vpop.f32.mrb[38].mxu1 }
 0x68a   :  { %v1048_v59 = vpack.c.bf16 %v1649_v58, %v1648_v56  ;;  %v1033_v60 = vpop.f32.mrb[39].mxu1  ;;  %1653 = vmatpush3.bf16.msra.mxu0 %v1046_v53 }
 0x68b   :  { %v1047_v61 = vpack.c.bf16 %v1033_v60, %v1030_v57 }
 0x68d   :  { %1654 = vmatprep.subr.bf16.mxu0 %v1047_v61 }
 0x68e   :  { %1655 = vmatpush3.bf16.msra.mxu0 %v1047_v61 }
 0x68f   :  { %1656 = vmatprep.subr.bf16.mxu0 %v1048_v59 }
 0x692   :  { %1657 = vmatpush3.bf16.msra.mxu0 %v1048_v59 }
 0x693   :  { %1666 = vmatprep.subr.bf16.mxu0 %v1770_v62 }
 0x695   :  { %1659 = vmatmul.mubr.msk.bf16.vlgmr.msra.gmra.mrb[0].mxu0 %vm393_vm0, %v1970_v26  ;;  %v1776_v26 = vld [vmem:[#allocation7 + $0x170] sm:$0xff]  }
 0x696   :  { %1662 = vmatprep.mubr.msk.bf16.mxu0 %vm393_vm0, %v1972_v27  ;;  %1667 = vmatpush3.bf16.msra.mxu0 %v1770_v62  ;;  %v1777_v27 = vld [vmem:[#allocation7 + $0x178] sm:$0xff]  }
 0x697   :  { %1668 = vmatprep.subr.bf16.mxu0 %v1771_v63 }
 0x69a   :  { %1669 = vmatpush3.bf16.msra.mxu0 %v1771_v63 }
 0x69b   :  { %1670 = vmatprep.subr.bf16.mxu0 %v1772_v0 }
 0x69d   :  { %1663 = vmatmul.mubr.msk.bf16.gmra.mrb[4].mxu0 %vm393_vm0, %v1978_v30  ;;  %v1364_v30 = vld [vmem:[%s2042_s3 + $0x4] ss:$0 sm:$0xff]  ;;  %s1844_s3 = scalar_lea.vmem %s1288_s11, 1024 }
 0x69e   :  { %1671 = vmatpush3.bf16.msra.mxu0 %v1772_v0  ;;  %v1696_v5 = vadd.f32 %v1364_v30, %v1300_v4  ;;  %p1845_p10 = scmp.ne.s32.totalorder %s1288_s11, %s1844_s3  ;;  %p1850_p12 = scmp.lt.s32.totalorder %s1844_s3, %s1844_s3 }
 0x69f   :  { %1672 = vmatprep.subr.bf16.mxu0 %v1773_v1 }
 0x6a0   :  { %p1851_p13 = por %p1850_p12, %p1849_p11 }
 0x6a2   :  { %1673 = vmatpush3.bf16.msra.mxu0 %v1773_v1  ;;  %p1852_p0 = pnand %p1851_p13, %p1845_p10 }
 0x6a3   :  { %1674 = vmatprep.subr.bf16.mxu0 %v1774_v2 }
 0x6a6   :  { %1675 = vmatpush3.bf16.msra.mxu0 %v1774_v2 }
 0x6a7   :  { %1676 = vmatprep.subr.bf16.mxu0 %v1775_v3 }
 0x6aa   :  { %1677 = vmatpush3.bf16.msra.mxu0 %v1775_v3 }
 0x6ab   :  { %1678 = vmatprep.subr.bf16.mxu0 %v1776_v26 }
 0x6ae   :  { %1679 = vmatpush3.bf16.msra.mxu0 %v1776_v26 }
 0x6af   :  { %1680 = vmatprep.subr.bf16.mxu0 %v1777_v27 }
 0x6b2   :  { %1681 = vmatpush3.bf16.msra.mxu0 %v1777_v27 }
 0x768   :  { %v1660_v6 = vpop.f32.mrb[0].mxu0 }
 0x769   :  { %v1690_v7 = vadd.f32 %v1660_v6, %v1300_v4  ;;  %v1088_v8 = vpop.f32.mrb[1].mxu0 }
 0x76a   :  { %v1692_v13 = vadd.f32 %v1300_v4, %v1088_v8  ;;  %v1661_v12 = vpop.f32.mrb[2].mxu0 }
 0x76b   :  { %v1691_v14 = vadd.f32 %v1690_v7, %v1364_v30  ;;  %v1695_v15 = vadd.f32 %v1696_v5, %v1661_v12  ;;  %v1091_v16 = vpop.f32.mrb[3].mxu0 }
 0x76c   :  { %v1693_v17 = vadd.f32 %v1692_v13, %v1364_v30  ;;  %v1697_v18 = vadd.f32 %v1696_v5, %v1091_v16 }
 0x76d   :  { %v1129_v19 = vmax.f32 %v1691_v14, 0.0  ;;  %v1130_v20 = vmax.f32 %v1695_v15, 0.0 }
 0x76e   :  { %v1127_v21 = vmax.f32 %v1693_v17, 0.0  ;;  %v1128_v9 = vmax.f32 %v1697_v18, 0.0 }
 0x76f   :  { %v1136_v22 = vpack.c.bf16 %v1130_v20, %v1129_v19 }
 0x770   :  { %v1135_v10 = vpack.c.bf16 %v1128_v9, %v1127_v21  ;;  %v1664_v11 = vpop.f32.mrb[4].mxu0 }
 0x771   :  { %v1699_v23 = vadd.f32 %v1696_v5, %v1664_v11  ;;  %v1104_v24 = vpop.f32.mrb[5].mxu0 }
 0x772   :  { %v1701_v25 = vadd.f32 %v1696_v5, %v1104_v24  ;;  %v1665_v28 = vpop.f32.mrb[6].mxu0  ;;  %1682 = vmatprep.mubr.bf16.mxu0 %v1135_v10 }
 0x773   :  { %v1703_v29 = vadd.f32 %v1696_v5, %v1665_v28  ;;  %v1107_v31 = vpop.f32.mrb[7].mxu0  ;;  %1683 = vmatmul.mubr.bf16.vlgmr.msra.gmra.mrb[24].mxu0 %v1136_v22  ;;  %v1133_v33 = vmax.f32 %v1699_v23, 0.0 }
 0x774   :  { %v1705_v32 = vadd.f32 %v1696_v5, %v1107_v31  ;;  %v1131_v35 = vmax.f32 %v1701_v25, 0.0 }
 0x775   :  { %v1134_v34 = vmax.f32 %v1703_v29, 0.0 }
 0x776   :  { %v1132_v36 = vmax.f32 %v1705_v32, 0.0 }
 0x777   :  { %v1138_v37 = vpack.c.bf16 %v1134_v34, %v1133_v33 }
 0x778   :  { %v1137_v38 = vpack.c.bf16 %v1132_v36, %v1131_v35 }
 0x77a   :  { %1686 = vmatprep.mubr.bf16.mxu0 %v1137_v38 }
 0x77b   :  { %1687 = vmatmul.mubr.bf16.gmra.mrb[28].mxu0 %v1138_v37 }
 0x846   :  { %v1684_v40 = vpop.f32.mrb[24].mxu0 }
 0x847   :  { %v1252_v41 = vadd.f32 %v1684_v40, %v1369_v39  ;;  %v1243_v42 = vpop.f32.mrb[25].mxu0 }
 0x848   :  { %v1244_v43 = vadd.f32 %v1369_v39, %v1243_v42  ;;  %v1685_v44 = vpop.f32.mrb[26].mxu0 }
 0x849   :  { %1276 = vst [vmem:[#allocation8 + $0x10] sm:$0xff] %v1252_v41  ;;  %v1255_v45 = vadd.f32 %v1685_v44, %v1369_v39  ;;  %v1246_v46 = vpop.f32.mrb[27].mxu0 }
 0x84a   :  { %1274 = vst [vmem:[#allocation8] sm:$0xff] %v1244_v43  ;;  %v1247_v47 = vadd.f32 %v1369_v39, %v1246_v46 }
 0x84b   :  { %1277 = vst [vmem:[#allocation8 + $0x18] sm:$0xff] %v1255_v45 }
 0x84c   :  { %1275 = vst [vmem:[#allocation8 + $0x8] sm:$0xff] %v1247_v47 }
 0x84e   :  { %v1688_v48 = vpop.f32.mrb[28].mxu0 }
 0x84f   :  { %v1268_v49 = vadd.f32 %v1688_v48, %v1369_v39  ;;  %v1259_v50 = vpop.f32.mrb[29].mxu0 }
 0x850   :  { %v1260_v51 = vadd.f32 %v1369_v39, %v1259_v50  ;;  %v1689_v52 = vpop.f32.mrb[30].mxu0 }
 0x851   :  { %1280 = vst [vmem:[#allocation8 + $0x30] sm:$0xff] %v1268_v49  ;;  %v1271_v53 = vadd.f32 %v1689_v52, %v1369_v39  ;;  %v1262_v54 = vpop.f32.mrb[31].mxu0 }
 0x852   :  { %1278 = vst [vmem:[#allocation8 + $0x20] sm:$0xff] %v1260_v51  ;;  %v1263_v55 = vadd.f32 %v1369_v39, %v1262_v54 }
 0x853   :  { %1281 = vst [vmem:[#allocation8 + $0x38] sm:$0xff] %v1271_v53 }
 0x854   :  { %1279 = vst [vmem:[#allocation8 + $0x28] sm:$0xff] %v1263_v55 }
 0x855   :  { %1855 = shalt.err (!%p1852_p0)
}
 0x856   :  { %s1856_s13 = scalar_lea.hbm %s2043_s4, 1024 }
 0x857   :  { %p1857_p1 = scmp.ne.s32.totalorder %s2043_s4, %s1856_s13  ;;  %p1860_p2 = scmp.lt.u32.totalorder %s1856_s13, %s2043_s4 }
 0x859   :  { %p1862_p3 = pnand %p1860_p2, %p1857_p1 }
 0x85b   :  { %1865 = shalt.err (!%p1862_p3)
}
 0x85c   :  { %s1878_s19 = smov 128   ;;  %s1879_s20 = smov 8  }
 0x85d   :  { %1293 = dma.vmem_to_hbm [thread:$0]  %s1288_s11, 1024, %s2043_s4, [#allocation4], %s1878_s19, %s1878_s19, %s1879_s20  }
 0x85e   :  { %1870 = dma.done.wait [#allocation4], 1024  }
 0x85f   :  { %1871 = vsyncadd [#allocation4], 4294966272 }
 0x860   :  { %1297 = vsyncpa [#allocation3], 1 }
 0x861   :  { %1298 = vsyncpa [#allocation6], 1 }
 0x862   :  { %1299 = vsyncpa [#allocation4], 1 }

</bundles_post_ra>
